<compile_context>
chip_gen: v7x
topology: tpu7x:2x2x1
jax: 0.10.0
libtpu: 0.0.40
codegen_flags: <defaults>
</compile_context>

<pallas_src>
import functools

import jax
import jax.numpy as jnp
from jax.experimental import pallas as pl
from jax.experimental.pallas import tpu as pltpu


_ROW = 16  # batch-row granularity: satisfies bf16 (16,128) and f32 (8,128) tiling


def _round_up(x, m):
    return ((x + m - 1) // m) * m


def _choose_tb(batch, tb_max):
    """Pick a batch tile (multiple of _ROW) and padded batch size.

    Keeps >= 2 grid steps when the batch allows it (v7x: both TensorCores),
    and keeps padding to < one tile of _ROW rows per step.
    """
    tb_max = max(_ROW, (tb_max // _ROW) * _ROW)
    b_g = _round_up(batch, _ROW)
    n_steps = max(2, pl.cdiv(b_g, tb_max)) if b_g > _ROW else 1
    tb = min(tb_max, _round_up(pl.cdiv(b_g, n_steps), _ROW))
    b_pad = _round_up(b_g, tb)
    return tb, b_pad


def _qnetwork_kernel(x_ref, w1_ref, w2_ref, w3_ref, b_ref, out_ref, *,
                     h1_units, h2_units, a_pad):
    # Static, 128-aligned slices of the packed bias (single DMA'd buffer).
    o2 = h1_units
    o3 = h1_units + h2_units
    b1 = b_ref[:, 0:h1_units]            # (1, H1) f32
    b2 = b_ref[:, o2:o2 + h2_units]      # (1, H2) f32
    b3 = b_ref[:, o3:o3 + a_pad]         # (1, A_pad) f32

    # x arrives in f32 (no wrapper-side cast pass); cast to bf16 for the MXU.
    x = x_ref[...].astype(jnp.bfloat16)

    # Layer 1: (TB, S) @ (S, H1), bf16 operands, f32 accumulation; bias+ReLU f32.
    h1 = jnp.dot(x, w1_ref[...], preferred_element_type=jnp.float32)
    h1 = jnp.maximum(h1 + b1, 0.0)
    # Layer 2: (TB, H1) @ (H1, H2)
    h2 = jnp.dot(h1.astype(w2_ref.dtype), w2_ref[...],
                 preferred_element_type=jnp.float32)
    h2 = jnp.maximum(h2 + b2, 0.0)
    # Layer 3: (TB, H2) @ (H2, A_pad)  -- lane-dense bf16 output tile.
    q = jnp.dot(h2.astype(w3_ref.dtype), w3_ref[...],
                preferred_element_type=jnp.float32)
    out_ref[...] = (q + b3).astype(out_ref.dtype)


def prepare_params(params):
    """One-time parameter prep (hoisted out of the forward path and cacheable):
    bf16 weight casts, w3 lane-padding to a multiple of 128, bias packing."""
    w1, b1 = params["w1"], params["b1"]
    w2, b2 = params["w2"], params["b2"]
    w3, b3 = params["w3"], params["b3"]

    S, H1 = w1.shape
    H2 = w2.shape[1]
    A = w3.shape[1]
    assert H1 % 128 == 0 and H2 % 128 == 0, \
        "h1_units/h2_units must be multiples of 128 (packed-bias static slicing)"
    A_pad = _round_up(A, 128)

    w1b = w1.astype(jnp.bfloat16)
    w2b = w2.astype(jnp.bfloat16)
    w3b = jnp.pad(w3, ((0, 0), (0, A_pad - A))).astype(jnp.bfloat16)
    b_packed = jnp.concatenate(
        [b1, b2, jnp.pad(b3, ((0, 0), (0, A_pad - A)))], axis=1
    ).astype(jnp.float32)                                  # (1, H1+H2+A_pad)

    return {"w1b": w1b, "w2b": w2b, "w3b": w3b, "b_packed": b_packed,
            "S": S, "H1": H1, "H2": H2, "A": A, "A_pad": A_pad}


def qnetwork_apply(state, prep, *, tb_max=1024):
    """state: (B, state_size) f32. prep: output of prepare_params()."""
    B, S = state.shape
    assert S == prep["S"], "state feature dim mismatch"
    H1, H2, A, A_pad = prep["H1"], prep["H2"], prep["A"], prep["A_pad"]

    TB, B_pad = _choose_tb(B, tb_max)
    grid = (B_pad // TB,)

    x = state
    if B_pad != B:
        x = jnp.pad(x, ((0, B_pad - B), (0, 0)))

    kernel = functools.partial(_qnetwork_kernel,
                               h1_units=H1, h2_units=H2, a_pad=A_pad)

    flops = 2 * B_pad * (S * H1 + H1 * H2 + H2 * A_pad)
    bytes_accessed = (B_pad * S * 4                       # x (f32 in)
                      + (S * H1 + H1 * H2 + H2 * A_pad) * 2   # bf16 weights
                      + (H1 + H2 + A_pad) * 4                 # packed bias
                      + B_pad * A_pad * 2)                    # bf16 out

    out = pl.pallas_call(
        kernel,
        out_shape=jax.ShapeDtypeStruct((B_pad, A_pad), jnp.bfloat16),
        grid=grid,
        in_specs=[
            pl.BlockSpec((TB, S), lambda i: (i, 0)),                # x: tiled over batch
            pl.BlockSpec((S, H1), lambda i: (0, 0)),                # weights resident across grid
            pl.BlockSpec((H1, H2), lambda i: (0, 0)),
            pl.BlockSpec((H2, A_pad), lambda i: (0, 0)),
            pl.BlockSpec((1, H1 + H2 + A_pad), lambda i: (0, 0)),   # packed biases (single stream)
        ],
        out_specs=pl.BlockSpec((TB, A_pad), lambda i: (i, 0)),
        compiler_params=pltpu.CompilerParams(
            dimension_semantics=("parallel",)),
        cost_estimate=pl.CostEstimate(flops=flops, transcendentals=0,
                                      bytes_accessed=bytes_accessed),
    )(x, prep["w1b"], prep["w2b"], prep["w3b"], prep["b_packed"])

    # Tiny slice + cast back to the module's f32 output dtype (B*A elements).
    return out[:B, :A].astype(jnp.float32)


def qnetwork_forward(state, params, *, tb_max=1024):
    """Convenience one-shot path (preps params per call). Prefer
    prepare_params() once + qnetwork_apply() for repeated forwards."""
    return qnetwork_apply(state, prepare_params(params), tb_max=tb_max)


def init_params(key, state_size, action_size, h1_units=128, h2_units=128):
    """Deterministic init mimicking nn.Linear default (uniform +-1/sqrt(fan_in))."""
    ks = jax.random.split(key, 6)

    def linear(kw, kb, fan_in, fan_out):
        bound = 1.0 / jnp.sqrt(fan_in)
        w = jax.random.uniform(kw, (fan_in, fan_out), jnp.float32, -bound, bound)
        b = jax.random.uniform(kb, (1, fan_out), jnp.float32, -bound, bound)
        return w, b

    w1, b1 = linear(ks[0], ks[1], state_size, h1_units)
    w2, b2 = linear(ks[2], ks[3], h1_units, h2_units)
    w3, b3 = linear(ks[4], ks[5], h2_units, action_size)
    return {"w1": w1, "b1": b1, "w2": w2, "b2": b2, "w3": w3, "b3": b3}


def _ref_forward_bf16(state, params):
    """Pure-JAX reference mirroring the kernel's numerics (bf16 MXU, f32 acc)."""
    bf = jnp.bfloat16
    h = jnp.dot(state.astype(bf), params["w1"].astype(bf),
                preferred_element_type=jnp.float32) + params["b1"]
    h = jnp.maximum(h, 0.0)
    h = jnp.dot(h.astype(bf), params["w2"].astype(bf),
                preferred_element_type=jnp.float32) + params["b2"]
    h = jnp.maximum(h, 0.0)
    return jnp.dot(h.astype(bf), params["w3"].astype(bf),
                   preferred_element_type=jnp.float32) + params["b3"]


def _ref_forward_f32(state, params):
    h = jnp.maximum(state @ params["w1"] + params["b1"], 0.0)
    h = jnp.maximum(h @ params["w2"] + params["b2"], 0.0)
    return h @ params["w3"] + params["b3"]


if __name__ == "__main__":
    key = jax.random.PRNGKey(0)
    k_params, k_state1, k_state2 = jax.random.split(key, 3)

    state_size = 16
    action_size = 4

    params = init_params(k_params, state_size, action_size, h1_units=128, h2_units=128)
    prep = prepare_params(params)                         # one-time, cached
    fwd = jax.jit(lambda s: qnetwork_apply(s, prep))

    # Small batch (single grid step).
    batch = 8
    state = jax.random.normal(k_state1, (batch, state_size), jnp.float32)
    q = jax.block_until_ready(fwd(state))
    assert q.shape == (batch, action_size)
    assert q.dtype == jnp.float32
    ref_bf = _ref_forward_bf16(state, params)
    assert jnp.allclose(q, ref_bf, atol=1e-2, rtol=1e-2)
    ref_f32 = _ref_forward_f32(state, params)
    assert jnp.allclose(q, ref_f32, atol=5e-2, rtol=5e-2)

    # Non-multiple batch (exercises padding + the >=2-step grid path).
    batch2 = 20
    state2 = jax.random.normal(k_state2, (batch2, state_size), jnp.float32)
    q2 = jax.block_until_ready(jax.jit(lambda s: qnetwork_apply(s, prep))(state2))
    assert q2.shape == (batch2, action_size)
    assert jnp.allclose(q2, _ref_forward_bf16(state2, params), atol=1e-2, rtol=1e-2)
    assert jnp.allclose(q2, _ref_forward_f32(state2, params), atol=5e-2, rtol=5e-2)

    print("KERNEL_OK")
</pallas_src>

<mosaic_0001>
module attributes {stable_mosaic.version = 11 : i64} {
  func.func @_qnetwork_kernel(%arg0: i32, %arg1: memref<16x16xf32, #tpu.memory_space<vmem>>, %arg2: memref<16x128xbf16, #tpu.memory_space<vmem>>, %arg3: memref<128x128xbf16, #tpu.memory_space<vmem>>, %arg4: memref<128x128xbf16, #tpu.memory_space<vmem>>, %arg5: memref<1x384xf32, #tpu.memory_space<vmem>>, %arg6: memref<16x128xbf16, #tpu.memory_space<vmem>>) attributes {dimension_semantics = [#tpu.dimension_semantics<parallel>], iteration_bounds = array<i64: 1>, scalar_prefetch = 0 : i64, scratch_operands = 0 : i64, tpu.core_type = #tpu.core_type<tc>, window_params = [{transform_indices = @transform_0, window_bounds = array<i64: 16, 16>}, {pipeline_mode = #tpu.pipeline_mode<synchronous>, transform_indices = @transform_1, window_bounds = array<i64: 16, 128>}, {pipeline_mode = #tpu.pipeline_mode<synchronous>, transform_indices = @transform_2, window_bounds = array<i64: 128, 128>}, {pipeline_mode = #tpu.pipeline_mode<synchronous>, transform_indices = @transform_3, window_bounds = array<i64: 128, 128>}, {pipeline_mode = #tpu.pipeline_mode<synchronous>, transform_indices = @transform_4, window_bounds = array<i64: 1, 384>}, {transform_indices = @transform_5, window_bounds = array<i64: 16, 128>}]} {
    %c0 = arith.constant 0 : index
    %c0_0 = arith.constant 0 : index
    %0 = vector.load %arg5[%c0, %c0_0] : memref<1x384xf32, #tpu.memory_space<vmem>>, vector<1x128xf32>
    %c0_1 = arith.constant 0 : index
    %c128 = arith.constant 128 : index
    %1 = vector.load %arg5[%c0_1, %c128] : memref<1x384xf32, #tpu.memory_space<vmem>>, vector<1x128xf32>
    %c0_2 = arith.constant 0 : index
    %c256 = arith.constant 256 : index
    %2 = vector.load %arg5[%c0_2, %c256] : memref<1x384xf32, #tpu.memory_space<vmem>>, vector<1x128xf32>
    %c0_3 = arith.constant 0 : index
    %c0_4 = arith.constant 0 : index
    %3 = vector.load %arg1[%c0_3, %c0_4] : memref<16x16xf32, #tpu.memory_space<vmem>>, vector<16x16xf32>
    %4 = arith.truncf %3 : vector<16x16xf32> to vector<16x16xbf16>
    %c0_5 = arith.constant 0 : index
    %c0_6 = arith.constant 0 : index
    %5 = vector.load %arg2[%c0_5, %c0_6] : memref<16x128xbf16, #tpu.memory_space<vmem>>, vector<16x128xbf16>
    %cst = arith.constant dense<0.000000e+00> : vector<16x128xf32>
    %6 = tpu.matmul %4, %5, %cst {dimension_numbers = #tpu.dot_dimension_numbers<[1], [0], [0], [1], [0, 0, 1, 1], [], []>} : vector<16x16xbf16>, vector<16x128xbf16>, vector<16x128xf32> -> vector<16x128xf32>
    %7 = vector.broadcast %0 : vector<1x128xf32> to vector<16x128xf32>
    %8 = arith.addf %6, %7 : vector<16x128xf32>
    %cst_7 = arith.constant 0.000000e+00 : f32
    %9 = vector.broadcast %cst_7 : f32 to vector<16x128xf32>
    %10 = arith.maximumf %8, %9 : vector<16x128xf32>
    %11 = arith.truncf %10 : vector<16x128xf32> to vector<16x128xbf16>
    %c0_8 = arith.constant 0 : index
    %c0_9 = arith.constant 0 : index
    %12 = vector.load %arg3[%c0_8, %c0_9] : memref<128x128xbf16, #tpu.memory_space<vmem>>, vector<128x128xbf16>
    %cst_10 = arith.constant dense<0.000000e+00> : vector<16x128xf32>
    %13 = tpu.matmul %11, %12, %cst_10 {dimension_numbers = #tpu.dot_dimension_numbers<[1], [0], [0], [1], [0, 0, 1, 1], [], []>} : vector<16x128xbf16>, vector<128x128xbf16>, vector<16x128xf32> -> vector<16x128xf32>
    %14 = vector.broadcast %1 : vector<1x128xf32> to vector<16x128xf32>
    %15 = arith.addf %13, %14 : vector<16x128xf32>
    %cst_11 = arith.constant 0.000000e+00 : f32
    %16 = vector.broadcast %cst_11 : f32 to vector<16x128xf32>
    %17 = arith.maximumf %15, %16 : vector<16x128xf32>
    %18 = arith.truncf %17 : vector<16x128xf32> to vector<16x128xbf16>
    %c0_12 = arith.constant 0 : index
    %c0_13 = arith.constant 0 : index
    %19 = vector.load %arg4[%c0_12, %c0_13] : memref<128x128xbf16, #tpu.memory_space<vmem>>, vector<128x128xbf16>
    %cst_14 = arith.constant dense<0.000000e+00> : vector<16x128xf32>
    %20 = tpu.matmul %18, %19, %cst_14 {dimension_numbers = #tpu.dot_dimension_numbers<[1], [0], [0], [1], [0, 0, 1, 1], [], []>} : vector<16x128xbf16>, vector<128x128xbf16>, vector<16x128xf32> -> vector<16x128xf32>
    %21 = vector.broadcast %2 : vector<1x128xf32> to vector<16x128xf32>
    %22 = arith.addf %20, %21 : vector<16x128xf32>
    %23 = arith.truncf %22 : vector<16x128xf32> to vector<16x128xbf16>
    %c0_15 = arith.constant 0 : index
    %c0_16 = arith.constant 0 : index
    %24 = vector.load %arg6[%c0_15, %c0_16] : memref<16x128xbf16, #tpu.memory_space<vmem>>, vector<16x128xbf16>
    tpu.vector_store %arg6[%c0_15, %c0_16], %23 {strides = array<i32>} : memref<16x128xbf16, #tpu.memory_space<vmem>>, vector<16x128xbf16>,
    return
  }
  func.func @transform_0(%arg0: i32) -> (i32, i32) {
    %c0_i32 = arith.constant 0 : i32
    %c0_i32_0 = arith.constant 0 : i32
    return %arg0, %c0_i32 : i32, i32
  }
  func.func @transform_1(%arg0: i32) -> (i32, i32) {
    %c0_i32 = arith.constant 0 : i32
    %c0_i32_0 = arith.constant 0 : i32
    %c0_i32_1 = arith.constant 0 : i32
    return %c0_i32, %c0_i32_0 : i32, i32
  }
  func.func @transform_2(%arg0: i32) -> (i32, i32) {
    %c0_i32 = arith.constant 0 : i32
    %c0_i32_0 = arith.constant 0 : i32
    %c0_i32_1 = arith.constant 0 : i32
    return %c0_i32, %c0_i32_0 : i32, i32
  }
  func.func @transform_3(%arg0: i32) -> (i32, i32) {
    %c0_i32 = arith.constant 0 : i32
    %c0_i32_0 = arith.constant 0 : i32
    %c0_i32_1 = arith.constant 0 : i32
    return %c0_i32, %c0_i32_0 : i32, i32
  }
  func.func @transform_4(%arg0: i32) -> (i32, i32) {
    %c0_i32 = arith.constant 0 : i32
    %c0_i32_0 = arith.constant 0 : i32
    %c0_i32_1 = arith.constant 0 : i32
    return %c0_i32, %c0_i32_0 : i32, i32
  }
  func.func @transform_5(%arg0: i32) -> (i32, i32) {
    %c0_i32 = arith.constant 0 : i32
    %c0_i32_0 = arith.constant 0 : i32
    return %arg0, %c0_i32 : i32, i32
  }
}

</mosaic_0001>

<bundles_post_ra>
// kernel: _lambda_.1
= control target key start
LH: loop header
LB: loop body
LE: loop exit
PB: predicated region body
PF: predicated region fallthrough
CT: control target
= control target key end

     0   :  { %10 = vsyncpa [#allocation3], 0  ;;  %s629_s0 = inlined_call_operand.vmem [shape: f32[16,16], index: 0, kind: input, shape index: {}]   ;;  %s630_s1 = inlined_call_operand.vmem [shape: bf16[16,128], index: 1, kind: input, shape index: {}]   ;;  %s631_s2 = inlined_call_operand.hbm [shape: bf16[128,128], index: 2, kind: input, shape index: {}]   ;;  %s632_s3 = inlined_call_operand.hbm [shape: bf16[128,128], index: 3, kind: input, shape index: {}]   ;;  %s633_s4 = inlined_call_operand.vmem [shape: f32[1,384], index: 4, kind: input, shape index: {}]   ;;  %s634_s5 = inlined_call_operand.vmem [shape: bf16[16,128], index: 5, kind: output, shape index: {}]  }
   0x1   :  { %11 = vsyncpa [#allocation5], 0  ;;  %s525_s18 = smov [#allocation2]   ;;  %s477_s22 = scalar_lea.hbm %s631_s2, 1024 }
   0x2   :  { %s21_s19 = sshll.u32 %s525_s18, 4  ;;  %p478_p0 = scmp.ne.s32.totalorder %s631_s2, %s477_s22  ;;  %s22_s19 = int_to_ptr.vmem [resolvable:$true] %s21_s19 }
   0x3   :  { %p481_p1 = scmp.lt.u32.totalorder %s477_s22, %s631_s2 }
   0x5   :  { %p483_p2 = pnand %p481_p1, %p478_p0 }
   0x7   :  { %486 = shalt.err (!%p483_p2)
}
   0x8   :  { %s487_s27 = scalar_lea.vmem %s22_s19, 1024  ;;  %p492_p4 = scmp.lt.s32.totalorder %s22_s19, %s22_s19 }
   0x9   :  { %p488_p3 = scmp.ne.s32.totalorder %s22_s19, %s487_s27  ;;  %p493_p5 = scmp.lt.s32.totalorder %s487_s27, %s487_s27 }
   0xb   :  { %p494_p6 = por %p493_p5, %p492_p4 }
   0xd   :  { %p495_p7 = pnand %p494_p6, %p488_p3 }
   0xf   :  { %498 = shalt.err (!%p495_p7)
}
  0x10   :  { %s526_s28 = smov 64   ;;  %s527_s29 = smov 4  }
  0x11   :  { %27 = dma.hbm_to_vmem [thread:$0]  %s631_s2, 1024, %s22_s19, [#allocation3], %s526_s28, %s526_s28, %s527_s29  }
  0x12   :  { %s528_s7 = smov [#allocation4]   ;;  %s499_s11 = scalar_lea.hbm %s632_s3, 1024 }
  0x13   :  { %s33_s8 = sshll.u32 %s528_s7, 4  ;;  %p500_p8 = scmp.ne.s32.totalorder %s632_s3, %s499_s11  ;;  %s34_s8 = int_to_ptr.vmem [resolvable:$true] %s33_s8 }
  0x14   :  { %p503_p9 = scmp.lt.u32.totalorder %s499_s11, %s632_s3 }
  0x16   :  { %p505_p10 = pnand %p503_p9, %p500_p8 }
  0x18   :  { %508 = shalt.err (!%p505_p10)
}
  0x19   :  { %s509_s16 = scalar_lea.vmem %s34_s8, 1024  ;;  %p514_p12 = scmp.lt.s32.totalorder %s34_s8, %s34_s8 }
  0x1a   :  { %p510_p11 = scmp.ne.s32.totalorder %s34_s8, %s509_s16  ;;  %p515_p13 = scmp.lt.s32.totalorder %s509_s16, %s509_s16 }
  0x1c   :  { %p516_p0 = por %p515_p13, %p514_p12 }
  0x1e   :  { %p517_p1 = pnand %p516_p0, %p510_p11 }
  0x20   :  { %520 = shalt.err (!%p517_p1)
}
  0x21   :  { %39 = dma.hbm_to_vmem [thread:$0]  %s632_s3, 1024, %s34_s8, [#allocation5], %s526_s28, %s526_s28, %s527_s29  }
  0x22   :  { %521 = dma.done.wait [#allocation3], 1024  }
  0x23   :  { %522 = vsyncadd [#allocation3], 4294966272 }
  0x24   :  { %523 = dma.done.wait [#allocation5], 1024  }
  0x25   :  { %524 = vsyncadd [#allocation5], 4294966272  ;;  %v529_v0 = vmov 0.0   ;;  %vm530_vm0 = vmmov 0   ;;  %v460_v1 = vld [vmem:[%s630_s1] sm:$0xff]   ;;  %v53_v3 = vld [vmem:[%s629_s0 + $0x8] sm:$0xff] }
  0x26   :  { %408 = vmatprep.subr.bf16.mxu0 %v529_v0  ;;  %410 = vmatprep.mubr.msk.bf16.mxu0 %vm530_vm0, %v529_v0  ;;  %v52_v2 = vld [vmem:[%s629_s0] sm:$0xff]  ;;  %vm69_vm1 = vcmask 130048   ;;  %v462_v6 = vld [vmem:[#allocation2 + $0x8] sm:$0xff]   ;;  %v463_v7 = vld [vmem:[#allocation2 + $0x10] sm:$0xff]  }
  0x27   :  { %414 = vmatprep.subr.bf16.mxu1 %v529_v0  ;;  %430 = vmatprep.mubr.msk.bf16.mxu1 %vm530_vm0, %v529_v0  ;;  %v54_v4 = vpack.c.bf16 %v53_v3, %v52_v2  ;;  %v461_v5 = vld [vmem:[#allocation2] sm:$0xff]   ;;  %v464_v8 = vld [vmem:[#allocation2 + $0x18] sm:$0xff]   ;;  %v466_v10 = vld [vmem:[#allocation2 + $0x28] sm:$0xff]  }
  0x28   :  { %409 = vmatpush3.bf16.msra.mxu0 %v460_v1  ;;  %415 = vmatpush3.bf16.msra.mxu1 %v461_v5  ;;  %v465_v9 = vld [vmem:[#allocation2 + $0x20] sm:$0xff]   ;;  %v467_v11 = vld [vmem:[#allocation2 + $0x30] sm:$0xff]   ;;  %v468_v12 = vld [vmem:[#allocation2 + $0x38] sm:$0xff]  }
  0x29   :  { %434 = vmatprep.subr.bf16.mxu0 %v529_v0  ;;  %416 = vmatprep.subr.bf16.mxu1 %v529_v0  ;;  %v469_v13 = vld [vmem:[#allocation4] sm:$0xff]   ;;  %v470_v14 = vld [vmem:[#allocation4 + $0x8] sm:$0xff]   ;;  %v471_v15 = vld [vmem:[#allocation4 + $0x10] sm:$0xff]  }
  0x2a   :  { %v472_v16 = vld [vmem:[#allocation4 + $0x18] sm:$0xff]   ;;  %v473_v17 = vld [vmem:[#allocation4 + $0x20] sm:$0xff]   ;;  %v474_v18 = vld [vmem:[#allocation4 + $0x28] sm:$0xff]  }
  0x2b   :  { %411 = vmatmul.mubr.msk.bf16.vlgmr.msra.gmra.mrb[0].mxu0 %vm69_vm1, %v54_v4  ;;  %v358_v19 = vld [vmem:[%s633_s4] ss:$0 sm:$0xff]  ;;  %v475_v29 = vld [vmem:[#allocation4 + $0x30] sm:$0xff]   ;;  %v476_v30 = vld [vmem:[#allocation4 + $0x38] sm:$0xff]  }
  0x2c   :  { %450 = vmatprep.mubr.msk.bf16.mxu0 %vm530_vm0, %v529_v0  ;;  %417 = vmatpush3.bf16.msra.mxu1 %v462_v6  ;;  %v361_v31 = vld [vmem:[%s633_s4 + $0x1] ss:$0 sm:$0xff]  ;;  %v370_v41 = vld [vmem:[%s633_s4 + $0x2] ss:$0 sm:$0xff] }
  0x2d   :  { %418 = vmatprep.subr.bf16.mxu1 %v529_v0  ;;  %435 = vmatpush3.bf16.msra.mxu0 %v469_v13 }
  0x2e   :  { %436 = vmatprep.subr.bf16.mxu0 %v529_v0 }
  0x30   :  { %419 = vmatpush3.bf16.msra.mxu1 %v463_v7 }
  0x31   :  { %420 = vmatprep.subr.bf16.mxu1 %v529_v0  ;;  %437 = vmatpush3.bf16.msra.mxu0 %v470_v14 }
  0x32   :  { %438 = vmatprep.subr.bf16.mxu0 %v529_v0 }
  0x34   :  { %421 = vmatpush3.bf16.msra.mxu1 %v464_v8 }
  0x35   :  { %422 = vmatprep.subr.bf16.mxu1 %v529_v0  ;;  %439 = vmatpush3.bf16.msra.mxu0 %v471_v15 }
  0x36   :  { %440 = vmatprep.subr.bf16.mxu0 %v529_v0 }
  0x38   :  { %423 = vmatpush3.bf16.msra.mxu1 %v465_v9 }
  0x39   :  { %424 = vmatprep.subr.bf16.mxu1 %v529_v0  ;;  %441 = vmatpush3.bf16.msra.mxu0 %v472_v16 }
  0x3a   :  { %442 = vmatprep.subr.bf16.mxu0 %v529_v0 }
  0x3c   :  { %425 = vmatpush3.bf16.msra.mxu1 %v466_v10 }
  0x3d   :  { %426 = vmatprep.subr.bf16.mxu1 %v529_v0  ;;  %443 = vmatpush3.bf16.msra.mxu0 %v473_v17 }
  0x3e   :  { %444 = vmatprep.subr.bf16.mxu0 %v529_v0 }
  0x40   :  { %427 = vmatpush3.bf16.msra.mxu1 %v467_v11 }
  0x41   :  { %428 = vmatprep.subr.bf16.mxu1 %v529_v0  ;;  %445 = vmatpush3.bf16.msra.mxu0 %v474_v18 }
  0x42   :  { %446 = vmatprep.subr.bf16.mxu0 %v529_v0 }
  0x44   :  { %429 = vmatpush3.bf16.msra.mxu1 %v468_v12 }
  0x45   :  { %447 = vmatpush3.bf16.msra.mxu0 %v475_v29 }
  0x46   :  { %448 = vmatprep.subr.bf16.mxu0 %v529_v0 }
  0x49   :  { %449 = vmatpush3.bf16.msra.mxu0 %v476_v30 }
  0xfe   :  { %v107_v20 = vpop.f32.mrb[0].mxu0 }
  0xff   :  { %v108_v21 = vadd.f32 %v358_v19, %v107_v20  ;;  %v412_v22 = vpop.f32.mrb[1].mxu0 }
 0x100   :  { %v110_v23 = vpop.f32.mrb[2].mxu0 }
 0x101   :  { %v111_v24 = vadd.f32 %v358_v19, %v110_v23  ;;  %v413_v25 = vpop.f32.mrb[3].mxu0  ;;  %v114_v26 = vmax.f32 %v108_v21, 0.0 }
 0x103   :  { %v115_v27 = vmax.f32 %v111_v24, 0.0 }
 0x105   :  { %v116_v28 = vpack.c.bf16 %v115_v27, %v114_v26 }
 0x107   :  { %431 = vmatmul.mubr.bf16.vlgmr.msra.gmra.mrb[0].mxu1 %v116_v28 }
 0x1da   :  { %v221_v32 = vpop.f32.mrb[0].mxu1 }
 0x1db   :  { %v222_v33 = vadd.f32 %v361_v31, %v221_v32  ;;  %v432_v34 = vpop.f32.mrb[1].mxu1 }
 0x1dc   :  { %v224_v35 = vpop.f32.mrb[2].mxu1 }
 0x1dd   :  { %v225_v36 = vadd.f32 %v361_v31, %v224_v35  ;;  %v433_v37 = vpop.f32.mrb[3].mxu1  ;;  %v228_v38 = vmax.f32 %v222_v33, 0.0 }
 0x1df   :  { %v229_v39 = vmax.f32 %v225_v36, 0.0 }
 0x1e1   :  { %v230_v40 = vpack.c.bf16 %v229_v39, %v228_v38 }
 0x1e3   :  { %451 = vmatmul.mubr.bf16.vlgmr.msra.gmra.mrb[4].mxu0 %v230_v40 }
 0x2b6   :  { %v335_v42 = vpop.f32.mrb[4].mxu0 }
 0x2b7   :  { %v452_v43 = vpop.f32.mrb[5].mxu0  ;;  %v336_v45 = vadd.f32 %v370_v41, %v335_v42 }
 0x2b8   :  { %v338_v44 = vpop.f32.mrb[6].mxu0 }
 0x2b9   :  { %v339_v46 = vadd.f32 %v370_v41, %v338_v44  ;;  %v453_v47 = vpop.f32.mrb[7].mxu0 }
 0x2bb   :  { %v386_v48 = vpack.c.bf16 %v339_v46, %v336_v45 }
 0x2bd   :  { %387 = vst [vmem:[%s634_s5] sm:$0xff] %v386_v48  }
 0x2be   :  { %356 = vsyncpa [#allocation3], 1 }
 0x2bf   :  { %357 = vsyncpa [#allocation5], 1 }

</bundles_post_ra>
